<compile_context>
chip_gen: v7x
topology: tpu7x:2x2x1
jax: 0.10.0
libtpu: 0.0.40
codegen_flags: <defaults>
</compile_context>

<pallas_src>
import functools

import jax
import jax.numpy as jnp
import numpy as np
from jax.experimental import pallas as pl
from jax.experimental.pallas import tpu as pltpu

# ---------------- model hyperparameters (small, deterministic) ----------------
VOCAB_SIZE = 50
EMB_DIM = 32
N_FILTERS = 8
FILTER_SIZES = (3, 4, 5)
OUT_DIM = 4
SEQ_LEN = 16
BATCH = 4
OUT_PAD = 128          # lane-dense output slab; only [:OUT_DIM] is meaningful
# Dropout is identity at inference time (eval mode).
# TODO(synk): training-mode dropout (pltpu.prng_random_bits mask) not implemented.


def _cnn_kernel(filter_sizes, seq_len, batch, n_filters,
                tok_ref, wf_ref, b_ref, mask_ref, fcw_ref, fcb_ref, out_ref):
    """Fused forward: one-hot @ W_fused -> shift/add conv -> mask -> pool -> fc."""
    N = tok_ref.shape[0]              # S * B, time-major flat rows: r = t*B + b
    B = batch
    S = seq_len
    F = n_filters
    W = len(filter_sizes) * F         # 24 lanes: [g0|g1|g2] x F (PyTorch cat order)
    KMAX = max(filter_sizes)
    V = wf_ref.shape[0]

    # ---- embedding gather fused with conv weights: ONE bf16 MXU matmul ----
    # W_fused = embedding_table @ conv_weights was folded offline, so this
    # single [N,V] @ [V, KMAX*W] matmul replaces gather + every convolution.
    tok = tok_ref[...]                                              # [N, 1] int32
    vocab_iota = jax.lax.broadcasted_iota(jnp.int32, (N, V), 1)
    onehot = (tok == vocab_iota).astype(jnp.bfloat16)               # exact 0/1
    proj = jnp.dot(onehot, wf_ref[...],
                   preferred_element_type=jnp.float32)              # [N, KMAX*W] f32

    # ---- "valid" conv as kernel-position-major shift-and-add ----
    # acc[r] = sum_k proj[r + k*B, k-slab]; groups lacking position k have zero
    # weight columns, so one roll+add per k covers all three filter sizes.
    acc = proj[:, :W]                                               # k = 0 slab
    for k in range(1, KMAX):
        slab = proj[:, k * W:(k + 1) * W]
        acc = acc + pltpu.roll(slab, shift=N - k * B, axis=0)       # row r <- row r + k*B

    # ---- mask tail rows (t >= S - fs_g + 1) with a precomputed additive -inf ----
    acc = acc + mask_ref[...]                                       # [N, W]

    # ---- max-pool over time (leading axis: pure VPU max across slabs), then
    #      bias + ReLU only on the pooled [B, W] (bias is time-constant, ReLU monotone)
    pooled = jnp.max(acc.reshape(S, B, W), axis=0)                  # [B, W]
    pooled = jnp.maximum(pooled + b_ref[...], 0.0)

    # ---- single FC matmul; lane-dense [B, 128] output slab ----
    # NOTE: the [B=4, 128] store is a masked partial-sublane vst — negligible here.
    out_ref[...] = jnp.dot(pooled.astype(jnp.bfloat16), fcw_ref[...],
                           preferred_element_type=jnp.float32) + fcb_ref[...]


def prepare_kernel_params(params):
    """One-time repack of PyTorch-layout params into kernel-friendly layouts."""
    E = params["embedding"].shape[1]
    F = N_FILTERS
    KMAX = max(FILTER_SIZES)
    W = len(FILTER_SIZES) * F

    # Kernel-position-major lane layout with zero columns where k >= fs_g, so
    # the in-kernel shift-and-add is one contiguous W-lane slab per k.
    slabs = []
    for k in range(KMAX):
        for g, fs in enumerate(FILTER_SIZES):
            slabs.append(params["conv_w"][g][k] if k < fs
                         else jnp.zeros((E, F), jnp.float32))
    w_all = jnp.concatenate(slabs, axis=1)                           # [E, KMAX*W]

    # Fold the embedding table into the conv weights (both static -> free at prep).
    w_fused = jnp.dot(params["embedding"].astype(jnp.float32), w_all)  # [V, KMAX*W]

    # Precomputed additive tail mask: 0 where t < S - fs_g + 1, else -inf (per lane group).
    # This also documents the roll-wrap invariant: every row whose shifted source
    # crosses the sequence end has t >= S - fs_g + 1 and is masked here.
    t_idx = jnp.arange(SEQ_LEN * BATCH, dtype=jnp.int32)[:, None] // BATCH    # [N, 1]
    l_row = jnp.concatenate(
        [jnp.full((F,), SEQ_LEN - fs + 1, jnp.int32) for fs in FILTER_SIZES])[None, :]
    tmask = jnp.where(t_idx < l_row, 0.0, -jnp.inf).astype(jnp.float32)       # [N, W]

    return {
        "w_fused": w_fused.astype(jnp.bfloat16),                              # [V, KMAX*W]
        "b_all": jnp.concatenate(params["conv_b"]).reshape(1, -1)
                    .astype(jnp.float32),                                     # [1, W]
        "tmask": tmask,                                                       # [N, W]
        "fc_w": jnp.pad(params["fc_w"],
                        ((0, 0), (0, OUT_PAD - OUT_DIM))).astype(jnp.bfloat16),   # [W, 128]
        "fc_b": jnp.pad(params["fc_b"],
                        (0, OUT_PAD - OUT_DIM)).reshape(1, -1).astype(jnp.float32),  # [1, 128]
    }


@jax.jit
def cnn_forward(x_tokens, kparams):
    """x_tokens: [seq_len, batch] int32 token ids (PyTorch convention).

    No wrapper transpose: the kernel works directly in the native time-major
    flat row order r = t*B + b.
    """
    S, B = x_tokens.shape
    tokens_flat = x_tokens.astype(jnp.int32).reshape(S * B, 1)

    kernel = functools.partial(_cnn_kernel, FILTER_SIZES, S, B, N_FILTERS)
    vmem = pl.BlockSpec(memory_space=pltpu.MemorySpace.VMEM)

    out_pad = pl.pallas_call(
        kernel,
        out_shape=jax.ShapeDtypeStruct((B, OUT_PAD), jnp.float32),
        in_specs=[vmem] * 6,
        out_specs=vmem,
        # NOTE: gridless single invocation is right at these toy sizes. If B/S
        # grow, switch to grid=(num_batch_tiles,) with per-tile BlockSpecs and
        # dimension_semantics=("parallel",) so both v7x TensorCores get work;
        # and once the vocab grows, replace the one-hot gather with a
        # PrefetchScalarGridSpec + pl.Element row gather of W_fused (the [N,V]
        # one-hot scales O(N*V) and hits v7x's 64 MiB VMEM first).
    )(tokens_flat, kparams["w_fused"], kparams["b_all"], kparams["tmask"],
      kparams["fc_w"], kparams["fc_b"])
    return out_pad[:, :OUT_DIM]


def cnn_reference(x_tokens, params):
    """Pure-JAX f32 reference matching the PyTorch forward (eval mode)."""
    x = jnp.transpose(x_tokens, (1, 0))                  # [B, S]
    emb = params["embedding"][x]                         # [B, S, E]
    pooled = []
    for g, fs in enumerate(FILTER_SIZES):
        w, b = params["conv_w"][g], params["conv_b"][g]  # [fs, E, F], [F]
        L = x.shape[1] - fs + 1
        conv = sum(jnp.einsum("ble,ef->blf", emb[:, k:k + L, :], w[k])
                   for k in range(fs)) + b               # [B, L, F]
        pooled.append(jnp.max(jax.nn.relu(conv), axis=1))
    cat = jnp.concatenate(pooled, axis=1)                # [B, 3*F]
    return cat @ params["fc_w"] + params["fc_b"]


def init_params(key):
    keys = jax.random.split(key, 3 + 2 * len(FILTER_SIZES))
    params = {}
    params["embedding"] = jax.random.normal(keys[0], (VOCAB_SIZE, EMB_DIM),
                                            jnp.float32) * 0.1
    conv_w, conv_b = [], []
    for i, fs in enumerate(FILTER_SIZES):
        # PyTorch Conv2d weight layout is [F, 1, fs, E]; we store it as [fs, E, F]
        w = jax.random.normal(keys[1 + 2 * i], (fs, EMB_DIM, N_FILTERS),
                              jnp.float32) * 0.1
        b = jax.random.normal(keys[2 + 2 * i], (N_FILTERS,), jnp.float32) * 0.1
        conv_w.append(w)
        conv_b.append(b)
    params["conv_w"] = conv_w
    params["conv_b"] = conv_b
    # PyTorch Linear weight is [out_dim, in_dim]; stored pre-transposed [in_dim, out_dim]
    in_dim = len(FILTER_SIZES) * N_FILTERS
    params["fc_w"] = jax.random.normal(keys[-2], (in_dim, OUT_DIM), jnp.float32) * 0.1
    params["fc_b"] = jax.random.normal(keys[-1], (OUT_DIM,), jnp.float32) * 0.1
    return params


if __name__ == "__main__":
    key = jax.random.PRNGKey(0)
    k_params, k_tokens = jax.random.split(key)
    params = init_params(k_params)
    kparams = prepare_kernel_params(params)   # one-time weight repack (not per forward)

    # PyTorch forward expects x of shape [seq_len, batch] (it permutes internally).
    x_tokens = jax.random.randint(k_tokens, (SEQ_LEN, BATCH), 0, VOCAB_SIZE,
                                  dtype=jnp.int32)

    out = jax.block_until_ready(cnn_forward(x_tokens, kparams))
    assert out.shape == (BATCH, OUT_DIM), out.shape

    # Correctness vs pure-JAX f32 reference (bf16 MXU operands -> loose tolerance).
    ref = cnn_reference(x_tokens, params)
    np.testing.assert_allclose(np.asarray(out), np.asarray(ref), rtol=5e-2, atol=5e-2)
    print("KERNEL_OK")
</pallas_src>

<mosaic_0001>
module attributes {stable_mosaic.version = 11 : i64} {
  func.func @_cnn_kernel(%arg0: memref<64x1xi32, #tpu.memory_space<vmem>>, %arg1: memref<50x120xbf16, #tpu.memory_space<vmem>>, %arg2: memref<1x24xf32, #tpu.memory_space<vmem>>, %arg3: memref<64x24xf32, #tpu.memory_space<vmem>>, %arg4: memref<24x128xbf16, #tpu.memory_space<vmem>>, %arg5: memref<1x128xf32, #tpu.memory_space<vmem>>, %arg6: memref<4x128xf32, #tpu.memory_space<vmem>>) attributes {dimension_semantics = [], scalar_prefetch = 0 : i64, scratch_operands = 0 : i64, tpu.core_type = #tpu.core_type<tc>} {
    %c0 = arith.constant 0 : index
    %c0_0 = arith.constant 0 : index
    %0 = vector.load %arg0[%c0, %c0_0] : memref<64x1xi32, #tpu.memory_space<vmem>>, vector<64x1xi32>
    %1 = tpu.iota {dimensions = array<i32: 1>} : vector<64x50xi32>
    %2 = vector.broadcast %0 : vector<64x1xi32> to vector<64x50xi32>
    %3 = arith.cmpi eq, %2, %1 : vector<64x50xi32>
    %4 = arith.extui %3 : vector<64x50xi1> to vector<64x50xi32>
    %5 = arith.sitofp %4 : vector<64x50xi32> to vector<64x50xf32>
    %6 = arith.truncf %5 : vector<64x50xf32> to vector<64x50xbf16>
    %c0_1 = arith.constant 0 : index
    %c0_2 = arith.constant 0 : index
    %7 = vector.load %arg1[%c0_1, %c0_2] : memref<50x120xbf16, #tpu.memory_space<vmem>>, vector<50x120xbf16>
    %cst = arith.constant dense<0.000000e+00> : vector<64x120xf32>
    %8 = tpu.matmul %6, %7, %cst {dimension_numbers = #tpu.dot_dimension_numbers<[1], [0], [0], [1], [0, 0, 1, 1], [], []>} : vector<64x50xbf16>, vector<50x120xbf16>, vector<64x120xf32> -> vector<64x120xf32>
    %9 = vector.extract_strided_slice %8 {offsets = [0, 0], sizes = [64, 24], strides = [1, 1]} : vector<64x120xf32> to vector<64x24xf32>
    %10 = vector.extract_strided_slice %8 {offsets = [0, 24], sizes = [64, 24], strides = [1, 1]} : vector<64x120xf32> to vector<64x24xf32>
    %c60_i32 = arith.constant 60 : i32
    %11 = tpu.dynamic_rotate %10 by %c60_i32 dim 0 : vector<64x24xf32>, i32 -> vector<64x24xf32>
    %12 = arith.addf %9, %11 : vector<64x24xf32>
    %13 = vector.extract_strided_slice %8 {offsets = [0, 48], sizes = [64, 24], strides = [1, 1]} : vector<64x120xf32> to vector<64x24xf32>
    %c56_i32 = arith.constant 56 : i32
    %14 = tpu.dynamic_rotate %13 by %c56_i32 dim 0 : vector<64x24xf32>, i32 -> vector<64x24xf32>
    %15 = arith.addf %12, %14 : vector<64x24xf32>
    %16 = vector.extract_strided_slice %8 {offsets = [0, 72], sizes = [64, 24], strides = [1, 1]} : vector<64x120xf32> to vector<64x24xf32>
    %c52_i32 = arith.constant 52 : i32
    %17 = tpu.dynamic_rotate %16 by %c52_i32 dim 0 : vector<64x24xf32>, i32 -> vector<64x24xf32>
    %18 = arith.addf %15, %17 : vector<64x24xf32>
    %19 = vector.extract_strided_slice %8 {offsets = [0, 96], sizes = [64, 24], strides = [1, 1]} : vector<64x120xf32> to vector<64x24xf32>
    %c48_i32 = arith.constant 48 : i32
    %20 = tpu.dynamic_rotate %19 by %c48_i32 dim 0 : vector<64x24xf32>, i32 -> vector<64x24xf32>
    %21 = arith.addf %18, %20 : vector<64x24xf32>
    %c0_3 = arith.constant 0 : index
    %c0_4 = arith.constant 0 : index
    %22 = vector.load %arg3[%c0_3, %c0_4] : memref<64x24xf32, #tpu.memory_space<vmem>>, vector<64x24xf32>
    %23 = arith.addf %21, %22 : vector<64x24xf32>
    %24 = vector.shape_cast %23 : vector<64x24xf32> to vector<16x4x24xf32>
    %cst_5 = arith.constant dense<0xFF800000> : vector<4x24xf32>
    %25 = vector.multi_reduction <maximumf>, %24, %cst_5 [0] : vector<16x4x24xf32> to vector<4x24xf32>
    %c0_6 = arith.constant 0 : index
    %c0_7 = arith.constant 0 : index
    %26 = vector.load %arg2[%c0_6, %c0_7] : memref<1x24xf32, #tpu.memory_space<vmem>>, vector<1x24xf32>
    %27 = vector.broadcast %26 : vector<1x24xf32> to vector<4x24xf32>
    %28 = arith.addf %25, %27 : vector<4x24xf32>
    %cst_8 = arith.constant 0.000000e+00 : f32
    %29 = vector.broadcast %cst_8 : f32 to vector<4x24xf32>
    %30 = arith.maximumf %28, %29 : vector<4x24xf32>
    %31 = arith.truncf %30 : vector<4x24xf32> to vector<4x24xbf16>
    %c0_9 = arith.constant 0 : index
    %c0_10 = arith.constant 0 : index
    %32 = vector.load %arg4[%c0_9, %c0_10] : memref<24x128xbf16, #tpu.memory_space<vmem>>, vector<24x128xbf16>
    %cst_11 = arith.constant dense<0.000000e+00> : vector<4x128xf32>
    %33 = tpu.matmul %31, %32, %cst_11 {dimension_numbers = #tpu.dot_dimension_numbers<[1], [0], [0], [1], [0, 0, 1, 1], [], []>} : vector<4x24xbf16>, vector<24x128xbf16>, vector<4x128xf32> -> vector<4x128xf32>
    %c0_12 = arith.constant 0 : index
    %c0_13 = arith.constant 0 : index
    %34 = vector.load %arg5[%c0_12, %c0_13] : memref<1x128xf32, #tpu.memory_space<vmem>>, vector<1x128xf32>
    %35 = vector.broadcast %34 : vector<1x128xf32> to vector<4x128xf32>
    %36 = arith.addf %33, %35 : vector<4x128xf32>
    %c0_14 = arith.constant 0 : index
    %c0_15 = arith.constant 0 : index
    %37 = vector.load %arg6[%c0_14, %c0_15] : memref<4x128xf32, #tpu.memory_space<vmem>>, vector<4x128xf32>
    tpu.vector_store %arg6[%c0_14, %c0_15], %36 {strides = array<i32>} : memref<4x128xf32, #tpu.memory_space<vmem>>, vector<4x128xf32>,
    return
  }
}

</mosaic_0001>

<bundles_post_ra>
// kernel: cnn_forward.1
= control target key start
LH: loop header
LB: loop body
LE: loop exit
PB: predicated region body
PF: predicated region fallthrough
CT: control target
= control target key end

     0   :  { %v629_v2 = vmov 0   ;;  %v630_v6 = vmov 0.0   ;;  %s921_s0 = inlined_call_operand.vmem [shape: s32[64,1], index: 0, kind: input, shape index: {}]   ;;  %s922_s1 = inlined_call_operand.vmem [shape: bf16[50,120], index: 1, kind: input, shape index: {}]   ;;  %s923_s2 = inlined_call_operand.vmem [shape: f32[1,24], index: 2, kind: input, shape index: {}]   ;;  %s924_s3 = inlined_call_operand.vmem [shape: f32[64,24], index: 3, kind: input, shape index: {}]   ;;  %s925_s4 = inlined_call_operand.vmem [shape: bf16[24,128], index: 4, kind: input, shape index: {}]   ;;  %s926_s5 = inlined_call_operand.vmem [shape: f32[1,128], index: 5, kind: input, shape index: {}]   ;;  %s927_s6 = inlined_call_operand.hbm [shape: f32[4,128], index: 6, kind: output, shape index: {}]  }
   0x1   :  { %v27_v0 = vld [vmem:[%s921_s0 + $0x10] sm:$0xff]  ;;  %v25_v1 = vld [vmem:[%s921_s0] sm:$0xff]  ;;  %598 = vset.pattern.permute.xlu1 %v629_v2  ;;  %597 = vset.pattern.permute.xlu0 %v629_v2  ;;  %v28_v3 = vld [vmem:[%s921_s0 + $0x18] sm:$0xff] }
   0x2   :  { %42 = vperm.xlu1 %598, %v27_v0   ;;  %36 = vperm.xlu0 %597, %v25_v1   ;;  %v26_v4 = vld [vmem:[%s921_s0 + $0x8] sm:$0xff]  ;;  %v599_v5 = vld [vmem:[%s922_s1] sm:$0xff]  }
   0x3   :  { %580 = vmatprep.subr.bf16.mxu1 %v630_v6  ;;  %v600_v7 = vld [vmem:[%s922_s1 + $0x8] sm:$0xff]   ;;  %564 = vmatprep.subr.bf16.mxu0 %v599_v5  ;;  %v29_v9 = vld [vmem:[%s921_s0 + $0x20] sm:$0xff] }
   0x4   :  { %v30_v8 = vld [vmem:[%s921_s0 + $0x28] sm:$0xff]  ;;  %565 = vmatpush3.bf16.msra.mxu0 %v599_v5 }
   0x6   :  { %45 = vperm.xlu1 %598, %v28_v3   ;;  %39 = vperm.xlu0 %597, %v26_v4  }
   0x7   :  { %11 = vsyncpa [#allocation3], 0  ;;  %566 = vmatprep.subr.bf16.mxu0 %v600_v7  ;;  %v601_v10 = vld [vmem:[%s922_s1 + $0x10] sm:$0xff]   ;;  %v32_v11 = vld [vmem:[%s921_s0 + $0x38] sm:$0xff]  ;;  %vm128_vm0 = vcmask 1040384   ;;  %v33_v15 = vlaneseq  ;;  %vm115_vm5 = vcmask 408576  }
   0x8   :  { %v31_v12 = vld [vmem:[%s921_s0 + $0x30] sm:$0xff]  ;;  %567 = vmatpush3.bf16.msra.mxu0 %v600_v7  ;;  %v602_v13 = vld [vmem:[%s922_s1 + $0x18] ss:$0 sps:$4 sm:$0x11]   ;;  %s631_s0 = smov 56   ;;  %s632_s1 = smov 104  }
   0x9   :  { %568 = vmatprep.subr.bf16.mxu0 %v601_v10  ;;  %v130_v14 = vsel %vm128_vm0, %v602_v13, 0  ;;  %v34_v16 = vand.u32 127, %v33_v15  ;;  %s633_s21 = smov 80   ;;  %s634_s22 = smov 32   ;;  %v603_v45 = vld [vmem:[%s925_s4] sm:$0xff]   ;;  %vm473_vm10 = vcmask 1043456  }
   0xa   :  { %51 = vperm.xlu1 %598, %v30_v8   ;;  %48 = vperm.xlu0 %597, %v29_v9   ;;  %v604_v46 = vld [vmem:[%s925_s4 + $0x8] ss:$0 sps:$4 sm:$0xff]   ;;  %vm635_vm11 = vmmov 0   ;;  %v811_v50 = vshrl.u32 %v33_v15, 7  ;;  %vm408_vm13 = vcmask 191488   ;;  %vm469_vm14 = vcmask 195584  }
   0xb   :  { %581 = vmatpush3.bf16.msra.mxu1 %v603_v45  ;;  %584 = vmatprep.mubr.msk.bf16.mxu1 %vm635_vm11, %v630_v6  ;;  %v475_v47 = vsel %vm473_vm10, %v604_v46, 0 }
   0xc   :  { %569 = vmatpush3.bf16.msra.mxu0 %v601_v10  ;;  %582 = vmatprep.subr.bf16.mxu1 %v630_v6  ;;  %vm239_vm12 = vcmp.lt.s32.totalorder %v811_v50, 4 }
   0xd   :  { %588 = vmatprep.subr.msk.bf16.mxu0 %vm128_vm0, %v602_v13 }
   0xe   :  { %57 = vperm.xlu1 %598, %v32_v11   ;;  %54 = vperm.xlu0 %597, %v31_v12  }
   0xf   :  { %583 = vmatpush3.bf16.msra.mxu1 %v475_v47 }
  0x10   :  { %571 = vmatpush3.bf16.msra.mxu0 %v130_v14 }
  0x81   :  { %v43_v17 = vpop.permute.xlu1 %42  ;;  %v37_v18 = vpop.permute.xlu0 %36 }
  0x82   :  { %vm61_vm1 = vcmp.eq.s32.totalorder %v43_v17, %v34_v16  ;;  %vm59_vm2 = vcmp.eq.s32.totalorder %v37_v18, %v34_v16 }
  0x83   :  { %v534_v21 = vsel %vm61_vm1, 1.0, %v630_v6  ;;  %v532_v22 = vsel %vm59_vm2, 1.0, %v630_v6 }
  0x85   :  { %v46_v19 = vpop.permute.xlu1 %45  ;;  %v40_v20 = vpop.permute.xlu0 %39 }
  0x86   :  { %vm62_vm3 = vcmp.eq.s32.totalorder %v46_v19, %v34_v16  ;;  %vm60_vm4 = vcmp.eq.s32.totalorder %v40_v20, %v34_v16 }
  0x87   :  { %v535_v23 = vsel %vm62_vm3, 1.0, %v630_v6  ;;  %v533_v24 = vsel %vm60_vm4, 1.0, %v630_v6 }
  0x88   :  { %v84_v25 = vpack.c.bf16 %v535_v23, %v534_v21  ;;  %v83_v26 = vpack.c.bf16 %v533_v24, %v532_v22 }
  0x89   :  { %v52_v27 = vpop.permute.xlu1 %51  ;;  %v49_v28 = vpop.permute.xlu0 %48 }
  0x8a   :  { %vm64_vm6 = vcmp.eq.s32.totalorder %v52_v27, %v34_v16  ;;  %vm63_vm7 = vcmp.eq.s32.totalorder %v49_v28, %v34_v16  ;;  %572 = vmatprep.mubr.msk.bf16.mxu0 %vm115_vm5, %v83_v26 }
  0x8b   :  { %v537_v29 = vsel %vm64_vm6, 1.0, %v630_v6  ;;  %v536_v30 = vsel %vm63_vm7, 1.0, %v630_v6  ;;  %573 = vmatmul.mubr.msk.bf16.vlgmr.msra.gmra.mrb[0].mxu0 %vm115_vm5, %v84_v25 }
  0x8c   :  { %v85_v31 = vpack.c.bf16 %v537_v29, %v536_v30 }
  0x8d   :  { %v58_v32 = vpop.permute.xlu1 %57  ;;  %v55_v33 = vpop.permute.xlu0 %54 }
  0x8e   :  { %vm66_vm8 = vcmp.eq.s32.totalorder %v58_v32, %v34_v16  ;;  %vm65_vm9 = vcmp.eq.s32.totalorder %v55_v33, %v34_v16  ;;  %576 = vmatprep.mubr.msk.bf16.mxu0 %vm115_vm5, %v85_v31 }
  0x8f   :  { %v539_v34 = vsel %vm66_vm8, 1.0, %v630_v6  ;;  %v538_v35 = vsel %vm65_vm9, 1.0, %v630_v6 }
  0x90   :  { %v86_v36 = vpack.c.bf16 %v539_v34, %v538_v35 }
  0x93   :  { %577 = vmatmul.mubr.msk.bf16.gmra.mrb[4].mxu0 %vm115_vm5, %v86_v36 }
 0x15e   :  { %v722_v37 = vpop.f32.mrb[0].mxu0 }
 0x15f   :  { %292 = vrot.lane.b32.xlu1 %v722_v37, %s631_s0  ;;  %209 = vrot.lane.b32.xlu0 %v722_v37, %s632_s1  ;;  %v728_v38 = vpop.f32.mrb[1].mxu0 }
 0x160   :  { %v730_v39 = vpop.f32.mrb[2].mxu0 }
 0x161   :  { %v732_v40 = vpop.f32.mrb[3].mxu0 }
 0x163   :  { %260 = vrot.lane.b32.xlu0 %v722_v37, %s633_s21  ;;  %288 = vrot.lane.b32.xlu1 %v728_v38, %s631_s0 }
 0x166   :  { %v738_v41 = vpop.f32.mrb[4].mxu0 }
 0x167   :  { %340 = vrot.lane.b32.xlu0 %v722_v37, %s634_s22  ;;  %211 = vrot.lane.b32.xlu1 %v730_v39, %s632_s1  ;;  %v744_v42 = vpop.f32.mrb[5].mxu0 }
 0x168   :  { %v746_v43 = vpop.f32.mrb[6].mxu0 }
 0x169   :  { %v748_v44 = vpop.f32.mrb[7].mxu0 }
 0x16b   :  { %205 = vrot.lane.b32.xlu0 %v728_v38, %s632_s1  ;;  %262 = vrot.lane.b32.xlu1 %v730_v39, %s633_s21 }
 0x16f   :  { %256 = vrot.lane.b32.xlu0 %v728_v38, %s633_s21  ;;  %342 = vrot.lane.b32.xlu1 %v730_v39, %s634_s22 }
 0x173   :  { %294 = vrot.lane.b32.xlu0 %v730_v39, %s631_s0  ;;  %207 = vrot.lane.b32.xlu1 %v732_v40, %s632_s1 }
 0x177   :  { %290 = vrot.lane.b32.xlu0 %v732_v40, %s631_s0  ;;  %258 = vrot.lane.b32.xlu1 %v732_v40, %s633_s21 }
 0x17b   :  { %300 = vrot.lane.b32.xlu1 %v738_v41, %s631_s0  ;;  %217 = vrot.lane.b32.xlu0 %v738_v41, %s632_s1 }
 0x17f   :  { %268 = vrot.lane.b32.xlu0 %v738_v41, %s633_s21  ;;  %296 = vrot.lane.b32.xlu1 %v744_v42, %s631_s0 }
 0x183   :  { %213 = vrot.lane.b32.xlu0 %v744_v42, %s632_s1  ;;  %219 = vrot.lane.b32.xlu1 %v746_v43, %s632_s1 }
 0x187   :  { %264 = vrot.lane.b32.xlu0 %v744_v42, %s633_s21  ;;  %270 = vrot.lane.b32.xlu1 %v746_v43, %s633_s21 }
 0x18b   :  { %302 = vrot.lane.b32.xlu0 %v746_v43, %s631_s0  ;;  %215 = vrot.lane.b32.xlu1 %v748_v44, %s632_s1 }
 0x18f   :  { %298 = vrot.lane.b32.xlu0 %v748_v44, %s631_s0  ;;  %350 = vrot.lane.b32.xlu1 %v746_v43, %s634_s22  ;;  %s636_s0 = smov [#allocation2]  }
 0x190   :  { %s524_s1 = sshll.u32 %s636_s0, 4  ;;  %s525_s1 = int_to_ptr.vmem [resolvable:$true] %s524_s1 }
 0x191   :  { %p610_p1 = scmp.lt.s32.totalorder %s525_s1, %s525_s1 }
 0x193   :  { %344 = vrot.lane.b32.xlu0 %v744_v42, %s634_s22  ;;  %266 = vrot.lane.b32.xlu1 %v748_v44, %s633_s21 }
 0x197   :  { %348 = vrot.lane.b32.xlu0 %v738_v41, %s634_s22  ;;  %346 = vrot.lane.b32.xlu1 %v748_v44, %s634_s22 }
 0x19b   :  { %336 = vrot.lane.b32.xlu0 %v728_v38, %s634_s22  ;;  %338 = vrot.lane.b32.xlu1 %v732_v40, %s634_s22 }
 0x1d1   :  { %v293_v48 = vpop.permute.xlu1 %292  ;;  %v210_v49 = vpop.permute.xlu0 %209 }
 0x1d2   :  { %v231_v55 = vrot.slane %v210_v49, 4  ;;  %v314_v10 = vrot.slane %v293_v48, 4 }
 0x1d5   :  { %v813_v51 = vpop.permute.xlu1 %288  ;;  %v261_v52 = vpop.permute.xlu0 %260 }
 0x1d9   :  { %v212_v53 = vpop.permute.xlu1 %211  ;;  %v341_v54 = vpop.permute.xlu0 %340 }
 0x1da   :  { %v232_v56 = vrot.slane %v212_v53, 4 }
 0x1dc   :  { %v244_v57 = vsel %vm239_vm12, %v231_v55, %v232_v56 }
 0x1dd   :  { %v263_v58 = vpop.permute.xlu1 %262  ;;  %v250_v59 = vadd.f32 %v722_v37, %v244_v57  ;;  %v206_v60 = vpop.permute.xlu0 %205 }
 0x1de   :  { %v229_v1 = vrot.slane %v206_v60, 4  ;;  %v368_v60 = vld [vmem:[%s924_s3] sm:$0xff] }
 0x1df   :  { %v282_v23 = vadd.f32 %v263_v58, %v250_v59 }
 0x1e1   :  { %v819_v61 = vpop.permute.xlu1 %342  ;;  %v257_v62 = vpop.permute.xlu0 %256 }
 0x1e5   :  { %v208_v63 = vpop.permute.xlu1 %207  ;;  %v295_v0 = vpop.permute.xlu0 %294 }
 0x1e6   :  { %v230_v2 = vrot.slane %v208_v63, 4  ;;  %v315_v4 = vrot.slane %v295_v0, 4 }
 0x1e8   :  { %v245_v3 = vsel %vm239_vm12, %v230_v2, %v231_v55  ;;  %v246_v5 = vsel %vm239_vm12, %v229_v1, %v230_v2  ;;  %v324_v14 = vsel %vm239_vm12, %v314_v10, %v315_v4 }
 0x1e9   :  { %v249_v6 = vadd.f32 %v245_v3, %v732_v40  ;;  %v259_v7 = vpop.permute.xlu1 %258  ;;  %v248_v8 = vadd.f32 %v246_v5, %v728_v38  ;;  %v291_v9 = vpop.permute.xlu0 %290  ;;  %v312_v40 = vrot.slane %v813_v51, 4 }
 0x1ea   :  { %v313_v11 = vrot.slane %v291_v9, 4  ;;  %v373_v9 = vld [vmem:[%s924_s3 + $0x28] sm:$0xff] }
 0x1eb   :  { %v281_v12 = vadd.f32 %v261_v52, %v249_v6  ;;  %v280_v13 = vadd.f32 %v259_v7, %v248_v8  ;;  %v370_v7 = vld [vmem:[%s924_s3 + $0x10] sm:$0xff] }
 0x1ec   :  { %v325_v15 = vsel %vm239_vm12, %v313_v11, %v314_v10  ;;  %v326_v46 = vsel %vm239_vm12, %v312_v40, %v313_v11 }
 0x1ed   :  { %v329_v16 = vadd.f32 %v324_v14, %v281_v12  ;;  %v328_v17 = vadd.f32 %v325_v15, %v280_v13  ;;  %v301_v18 = vpop.permute.xlu1 %300  ;;  %v218_v19 = vpop.permute.xlu0 %217 }
 0x1ee   :  { %v235_v28 = vrot.slane %v218_v19, 4 }
 0x1ef   :  { %v361_v0 = vadd.f32 %v819_v61, %v329_v16 }
 0x1f1   :  { %v297_v20 = vpop.permute.xlu1 %296  ;;  %v269_v21 = vpop.permute.xlu0 %268 }
 0x1f2   :  { %v316_v22 = vrot.slane %v297_v20, 4  ;;  %v371_v20 = vld [vmem:[%s924_s3 + $0x18] sm:$0xff] }
 0x1f4   :  { %v323_v24 = vsel %vm239_vm12, %v315_v4, %v316_v22 }
 0x1f5   :  { %v220_v25 = vpop.permute.xlu1 %219  ;;  %v214_v26 = vpop.permute.xlu0 %213  ;;  %v330_v27 = vadd.f32 %v323_v24, %v282_v23 }
 0x1f6   :  { %v236_v29 = vrot.slane %v220_v25, 4  ;;  %v233_v30 = vrot.slane %v214_v26, 4 }
 0x1f8   :  { %v247_v31 = vsel %vm239_vm12, %v236_v29, %v229_v1  ;;  %v240_v32 = vsel %vm239_vm12, %v235_v28, %v236_v29  ;;  %v243_v33 = vsel %vm239_vm12, %v232_v56, %v233_v30 }
 0x1f9   :  { %v255_v34 = vadd.f32 %v746_v43, %v247_v31  ;;  %v271_v35 = vpop.permute.xlu1 %270  ;;  %v254_v36 = vadd.f32 %v738_v41, %v240_v32  ;;  %v251_v37 = vadd.f32 %v730_v39, %v243_v33  ;;  %v265_v38 = vpop.permute.xlu0 %264  ;;  %v360_v43 = vadd.f32 %v341_v54, %v328_v17 }
 0x1fb   :  { %v287_v45 = vadd.f32 %v257_v62, %v255_v34  ;;  %v286_v55 = vadd.f32 %v271_v35, %v254_v36  ;;  %v318_v62 = vrot.slane %v301_v18, 4  ;;  %v283_v1 = vadd.f32 %v265_v38, %v251_v37 }
 0x1fc   :  { %v376_v4 = vadd.f32 %v368_v60, %v360_v43 }
 0x1fd   :  { %v216_v47 = vpop.permute.xlu1 %215  ;;  %v303_v48 = vpop.permute.xlu0 %302  ;;  %v845_v49 = vadd.f32 %v326_v46, %v287_v45 }
 0x1fe   :  { %v234_v52 = vrot.slane %v216_v47, 4  ;;  %v319_v53 = vrot.slane %v303_v48, 4  ;;  %v392_v15 = vcombine.high %v376_v4, %v376_v4  ;;  %v409_v19 = vsel %vm408_vm13, %v376_v4, -inf  ;;  %v375_v47 = vld [vmem:[%s924_s3 + $0x38] sm:$0xff] }
 0x200   :  { %v241_v41 = vsel %vm239_vm12, %v234_v52, %v235_v28  ;;  %v242_v39 = vsel %vm239_vm12, %v233_v30, %v234_v52  ;;  %v327_v51 = vsel %vm239_vm12, %v319_v53, %v312_v40  ;;  %v320_v3 = vsel %vm239_vm12, %v318_v62, %v319_v53 }
 0x201   :  { %v253_v56 = vadd.f32 %v241_v41, %v748_v44  ;;  %v351_v57 = vpop.permute.xlu1 %350  ;;  %v299_v58 = vpop.permute.xlu0 %298  ;;  %v252_v59 = vadd.f32 %v242_v39, %v744_v42  ;;  %v334_v54 = vadd.f32 %v327_v51, %v286_v55  ;;  %v369_v44 = vld [vmem:[%s924_s3 + $0x8] sm:$0xff]  ;;  %v410_v29 = vsel %vm408_vm13, %v392_v15, -inf  ;;  %v374_v55 = vld [vmem:[%s924_s3 + $0x30] sm:$0xff] }
 0x202   :  { %v317_v63 = vrot.slane %v299_v58, 4  ;;  %v377_v13 = vadd.f32 %v369_v44, %v361_v0 }
 0x203   :  { %v285_v2 = vadd.f32 %v269_v21, %v253_v56 }
 0x204   :  { %v322_v42 = vsel %vm239_vm12, %v316_v22, %v317_v63  ;;  %v321_v14 = vsel %vm239_vm12, %v317_v63, %v318_v62  ;;  %v372_v22 = vld [vmem:[%s924_s3 + $0x20] sm:$0xff]  ;;  %v393_v28 = vcombine.high %v377_v13, %v377_v13  ;;  %v411_v35 = vsel %vm408_vm13, %v377_v13, -inf }
 0x205   :  { %v333_v5 = vadd.f32 %v320_v3, %v285_v2  ;;  %v267_v6 = vpop.permute.xlu1 %266  ;;  %v345_v61 = vpop.permute.xlu0 %344  ;;  %v331_v8 = vadd.f32 %v322_v42, %v283_v1  ;;  %v549_v13 = vld [vmem:[%s926_s5] ss:$0 sm:$0xff] }
 0x206   :  { %v284_v10 = vadd.f32 %v267_v6, %v252_v59  ;;  %v362_v11 = vadd.f32 %v345_v61, %v330_v27  ;;  %v412_v39 = vsel %vm408_vm13, %v393_v28, -inf }
 0x207   :  { %v365_v12 = vadd.f32 %v351_v57, %v333_v5 }
 0x208   :  { %v378_v16 = vadd.f32 %v370_v7, %v362_v11  ;;  %v332_v17 = vadd.f32 %v321_v14, %v284_v10 }
 0x209   :  { %v381_v18 = vadd.f32 %v373_v9, %v365_v12  ;;  %v347_v21 = vpop.permute.xlu1 %346  ;;  %v349_v23 = vpop.permute.xlu0 %348 }
 0x20a   :  { %v394_v24 = vcombine.high %v378_v16, %v378_v16  ;;  %v413_v50 = vsel %vm408_vm13, %v378_v16, -inf  ;;  %v363_v25 = vadd.f32 %v347_v21, %v331_v8  ;;  %v364_v26 = vadd.f32 %v349_v23, %v332_v17  ;;  %v548_v8 = vld [vmem:[%s923_s2] ss:$0 sm:$0xff]  ;;  %s605_s2 = scalar_lea.vmem %s525_s1, 64 }
 0x20b   :  { %v414_v27 = vmax.f32 %v409_v19, %v413_v50  ;;  %v397_v33 = vcombine.high %v381_v18, %v381_v18  ;;  %v425_v41 = vsel %vm408_vm13, %v381_v18, -inf  ;;  %p606_p0 = scmp.ne.s32.totalorder %s525_s1, %s605_s2  ;;  %p611_p2 = scmp.lt.s32.totalorder %s605_s2, %s605_s2 }
 0x20c   :  { %v415_v30 = vsel %vm408_vm13, %v394_v24, -inf  ;;  %v379_v31 = vadd.f32 %v371_v20, %v363_v25  ;;  %v380_v32 = vadd.f32 %v372_v22, %v364_v26 }
 0x20d   :  { %v416_v34 = vmax.f32 %v410_v29, %v415_v30  ;;  %v339_v36 = vpop.permute.xlu1 %338  ;;  %v337_v37 = vpop.permute.xlu0 %336  ;;  %v427_v62 = vsel %vm408_vm13, %v397_v33, -inf  ;;  %p612_p3 = por %p611_p2, %p610_p1 }
 0x20e   :  { %v395_v38 = vcombine.high %v379_v31, %v379_v31  ;;  %v417_v40 = vsel %vm408_vm13, %v379_v31, -inf  ;;  %v396_v45 = vcombine.high %v380_v32, %v380_v32  ;;  %v421_v46 = vsel %vm408_vm13, %v380_v32, -inf }
 0x20f   :  { %v418_v48 = vmax.f32 %v411_v35, %v417_v40  ;;  %v422_v52 = vmax.f32 %v414_v27, %v421_v46  ;;  %v367_v53 = vadd.f32 %v339_v36, %v845_v49  ;;  %v366_v43 = vadd.f32 %v337_v37, %v334_v54  ;;  %p613_p4 = pnand %p612_p3, %p606_p0 }
 0x210   :  { %v419_v51 = vsel %vm408_vm13, %v395_v38, -inf  ;;  %v423_v56 = vsel %vm408_vm13, %v396_v45, -inf }
 0x211   :  { %v420_v57 = vmax.f32 %v412_v39, %v419_v51  ;;  %v424_v58 = vmax.f32 %v416_v34, %v423_v56  ;;  %v383_v59 = vadd.f32 %v375_v47, %v367_v53  ;;  %v426_v60 = vmax.f32 %v418_v48, %v425_v41 }
 0x212   :  { %v382_v49 = vadd.f32 %v374_v55, %v366_v43 }
 0x213   :  { %v399_v63 = vcombine.high %v383_v59, %v383_v59  ;;  %v428_v0 = vmax.f32 %v420_v57, %v427_v62  ;;  %v433_v1 = vsel %vm408_vm13, %v383_v59, -inf }
 0x214   :  { %v434_v54 = vmax.f32 %v426_v60, %v433_v1  ;;  %v398_v2 = vcombine.high %v382_v49, %v382_v49  ;;  %v429_v3 = vsel %vm408_vm13, %v382_v49, -inf }
 0x215   :  { %v435_v4 = vsel %vm408_vm13, %v399_v63, -inf  ;;  %v430_v44 = vmax.f32 %v422_v52, %v429_v3 }
 0x216   :  { %v436_v42 = vmax.f32 %v428_v0, %v435_v4  ;;  %v431_v5 = vsel %vm408_vm13, %v398_v2, -inf }
 0x217   :  { %v432_v6 = vmax.f32 %v424_v58, %v431_v5 }
 0x218   :  { %v438_v7 = vmax.f32 %v434_v54, %v436_v42 }
 0x219   :  { %v437_v61 = vmax.f32 %v430_v44, %v432_v6 }
 0x21b   :  { %v439_v9 = vmax.f32 %v437_v61, %v438_v7 }
 0x21d   :  { %v447_v10 = vadd.f32 %v548_v8, %v439_v9 }
 0x21f   :  { %v448_v11 = vmax.f32 %v447_v10, 0.0 }
 0x221   :  { %v449_v12 = vpack.c.bf16 %v448_v11, %v448_v11 }
 0x223   :  { %585 = vmatmul.mubr.msk.bf16.vlgmr.msra.gmra.mrb[0].mxu1 %vm469_vm14, %v449_v12 }
 0x2f6   :  { %v511_v14 = vpop.f32.mrb[0].mxu1 }
 0x2f7   :  { %v512_v15 = vadd.f32 %v549_v13, %v511_v14  ;;  %v586_v16 = vpop.f32.mrb[1].mxu1 }
 0x2f8   :  { %v514_v17 = vpop.f32.mrb[2].mxu1 }
 0x2f9   :  { %517 = vst [vmem:[#allocation2] sm:$0xf] %v512_v15  ;;  %v587_v18 = vpop.f32.mrb[3].mxu1 }
 0x2fa   :  { %616 = shalt.err (!%p613_p4)
}
 0x2fb   :  { %s617_s5 = scalar_lea.hbm %s927_s6, 64 }
 0x2fc   :  { %p618_p5 = scmp.ne.s32.totalorder %s927_s6, %s617_s5  ;;  %p621_p6 = scmp.lt.u32.totalorder %s617_s5, %s927_s6 }
 0x2fe   :  { %p623_p7 = pnand %p621_p6, %p618_p5 }
 0x300   :  { %626 = shalt.err (!%p623_p7)
}
 0x301   :  { %527 = dma.vmem_to_hbm [thread:$0]  %s525_s1, 64, %s927_s6, [#allocation3]  }
 0x302   :  { %627 = dma.done.wait [#allocation3], 64  }
 0x303   :  { %628 = vsyncadd [#allocation3], 4294967232 }
 0x304   :  { %531 = vsyncpa [#allocation3], 1 }

</bundles_post_ra>
